<compile_context>
chip_gen: v7x
topology: tpu7x:2x2x1
jax: 0.10.0
libtpu: 0.0.40
codegen_flags: <defaults>
</compile_context>

<pallas_src>
import jax
import jax.numpy as jnp
from jax.experimental import pallas as pl
from jax.experimental.pallas import tpu as pltpu

# Logical dims of the PyTorch module.
IN, H1, H2, OUT = 3, 16, 32, 92
LANE = 128  # lane-dense padded width for hidden/output features inside the kernel

# Row offsets of each tensor inside the packed (SLAB_ROWS, 128) parameter slab.
W1_R0 = 0      # rows [0, 3)    : W1 (3, 16)  zero-padded to lanes [0, 128)
B1_R0 = 8      # row 8          : b1 padded to (1, 128)
W2_R0 = 16     # rows [16, 144) : W2 padded to (128, 128)
B2_R0 = 144    # row 144        : b2 padded to (1, 128)
W3_R0 = 152    # rows [152, 280): W3 padded to (128, 128)
B3_R0 = 280    # row 280        : b3 padded to (1, 128)
SLAB_ROWS = 288

MAX_TILE_B = 2048  # VMEM-safe on every generation (incl. v5e's 16 MiB default)


def mlp_kernel(x_ref, p_ref, o_ref):
    # x_ref: (tile_b, 3); p_ref: (SLAB_ROWS, 128); o_ref: (tile_b, 92)
    x = x_ref[...]
    w1 = p_ref[W1_R0:W1_R0 + IN, :]     # (3, 128); K=3 is padded internally by Mosaic
    b1 = p_ref[B1_R0:B1_R0 + 1, :]
    w2 = p_ref[W2_R0:W2_R0 + LANE, :]
    b2 = p_ref[B2_R0:B2_R0 + 1, :]
    w3 = p_ref[W3_R0:W3_R0 + LANE, :]
    b3 = p_ref[B3_R0:B3_R0 + 1, :]

    # Zero padding in the weights/biases keeps the padded lanes exactly 0 through
    # bias-add and ReLU, so the padded math equals the unpadded math.
    h1 = jnp.maximum(jnp.dot(x, w1, preferred_element_type=jnp.float32) + b1, 0.0)
    h2 = jnp.maximum(jnp.dot(h1, w2, preferred_element_type=jnp.float32) + b2, 0.0)
    out = jnp.dot(h2, w3, preferred_element_type=jnp.float32) + b3   # (tile_b, 128)
    o_ref[...] = out[:, :OUT].astype(o_ref.dtype)                    # lane-masked store


def pack_params(w1, b1, w2, b2, w3, b3):
    """Pack nn.Linear params (stored as (in, out) weights) into one lane-dense slab."""
    slab = jnp.zeros((SLAB_ROWS, LANE), jnp.float32)
    slab = slab.at[W1_R0:W1_R0 + IN, 0:H1].set(w1)
    slab = slab.at[B1_R0, 0:H1].set(b1.reshape(-1))
    slab = slab.at[W2_R0:W2_R0 + H1, 0:H2].set(w2)
    slab = slab.at[B2_R0, 0:H2].set(b2.reshape(-1))
    slab = slab.at[W3_R0:W3_R0 + H2, 0:OUT].set(w3)
    slab = slab.at[B3_R0, 0:OUT].set(b3.reshape(-1))
    return slab


def _pick_tile_b(batch):
    """Aim for ~4 grid steps (v7x megacore sharding), 128-row multiple, <= 2048 rows."""
    t = -(-batch // 4)                 # cdiv(batch, 4)
    t = ((t + 127) // 128) * 128       # round up to sublane/MXU-friendly multiple
    return max(128, min(MAX_TILE_B, t))


def mlp_forward(x, params_slab, *, tile_b=None):
    """x: (B, 3) f32 -> (B, 92) f32, identical to the PyTorch forward."""
    B = x.shape[0]
    if tile_b is None:
        tile_b = _pick_tile_b(B)
    grid = -(-B // tile_b)             # Pallas masks the ragged last tile if B % tile_b != 0

    flops = 2 * B * (IN * H1 + H1 * H2 + H2 * OUT)
    bytes_accessed = 4 * (B * IN + B * OUT + SLAB_ROWS * LANE)

    return pl.pallas_call(
        mlp_kernel,
        out_shape=jax.ShapeDtypeStruct((B, OUT), jnp.float32),
        grid_spec=pltpu.PrefetchScalarGridSpec(
            num_scalar_prefetch=0,
            grid=(grid,),
            in_specs=[
                # activations stream per batch tile; last dim (3) == full array dim
                pl.BlockSpec((tile_b, IN), lambda i: (i, 0)),
                # packed weights: constant index_map -> loaded once, VMEM-resident;
                # single-buffered since it never changes across grid steps.
                pl.BlockSpec((SLAB_ROWS, LANE), lambda i: (0, 0),
                             pipeline_mode=pl.Buffered(1)),
            ],
            # output written directly at its logical (B, 92) shape: no post-kernel slice
            out_specs=pl.BlockSpec((tile_b, OUT), lambda i: (i, 0)),
        ),
        compiler_params=pltpu.CompilerParams(
            dimension_semantics=("parallel",),
        ),
        cost_estimate=pl.CostEstimate(
            flops=flops, transcendentals=0, bytes_accessed=bytes_accessed),
    )(x, params_slab)


def init_params(key):
    """Deterministic init mimicking nn.Linear's Kaiming-uniform default.

    Weights stored transposed as (in, out) so y = x @ W + b matches
    PyTorch's y = x @ weight.T + bias.
    """
    dims = [(IN, H1), (H1, H2), (H2, OUT)]
    params = []
    for i, (fan_in, fan_out) in enumerate(dims):
        kw, kb, key = jax.random.split(jax.random.fold_in(key, i), 3)
        bound = 1.0 / jnp.sqrt(fan_in)
        w = jax.random.uniform(kw, (fan_in, fan_out), jnp.float32, -bound, bound)
        b = jax.random.uniform(kb, (fan_out,), jnp.float32, -bound, bound)
        params.extend([w, b])
    return params


def reference_forward(x, params):
    w1, b1, w2, b2, w3, b3 = params
    h1 = jnp.maximum(x @ w1 + b1, 0.0)
    h2 = jnp.maximum(h1 @ w2 + b2, 0.0)
    return h2 @ w3 + b3


if __name__ == "__main__":
    key = jax.random.PRNGKey(0)
    kx, kp = jax.random.split(key)
    batch = 256  # two 128-row tiles -> exercises the parallel batch grid
    x = jax.random.normal(kx, (batch, IN), dtype=jnp.float32)
    params = init_params(kp)
    slab = pack_params(*params)

    out = mlp_forward(x, slab)
    jax.block_until_ready(out)

    ref = reference_forward(x, params)
    assert out.shape == (batch, OUT), out.shape
    assert jnp.allclose(out, ref, atol=1e-4, rtol=1e-4), "mismatch vs reference"
    print("KERNEL_OK")
</pallas_src>

<mosaic_0001>
module attributes {stable_mosaic.version = 11 : i64} {
  func.func @mlp_kernel(%arg0: i32, %arg1: memref<128x3xf32, #tpu.memory_space<vmem>>, %arg2: memref<288x128xf32, #tpu.memory_space<vmem>>, %arg3: memref<128x92xf32, #tpu.memory_space<vmem>>) attributes {dimension_semantics = [#tpu.dimension_semantics<parallel>], iteration_bounds = array<i64: 2>, scalar_prefetch = 0 : i64, scratch_operands = 0 : i64, tpu.core_type = #tpu.core_type<tc>, window_params = [{transform_indices = @transform_0, window_bounds = array<i64: 128, 3>}, {pipeline_mode = #tpu.pipeline_mode<synchronous>, transform_indices = @transform_1, window_bounds = array<i64: 288, 128>}, {transform_indices = @transform_2, window_bounds = array<i64: 128, 92>}]} {
    %c0 = arith.constant 0 : index
    %c0_0 = arith.constant 0 : index
    %0 = vector.load %arg1[%c0, %c0_0] : memref<128x3xf32, #tpu.memory_space<vmem>>, vector<128x3xf32>
    %c0_1 = arith.constant 0 : index
    %c0_2 = arith.constant 0 : index
    %1 = vector.load %arg2[%c0_1, %c0_2] : memref<288x128xf32, #tpu.memory_space<vmem>>, vector<3x128xf32>
    %c8 = arith.constant 8 : index
    %c0_3 = arith.constant 0 : index
    %2 = vector.load %arg2[%c8, %c0_3] : memref<288x128xf32, #tpu.memory_space<vmem>>, vector<1x128xf32>
    %c16 = arith.constant 16 : index
    %c0_4 = arith.constant 0 : index
    %3 = vector.load %arg2[%c16, %c0_4] : memref<288x128xf32, #tpu.memory_space<vmem>>, vector<128x128xf32>
    %c144 = arith.constant 144 : index
    %c0_5 = arith.constant 0 : index
    %4 = vector.load %arg2[%c144, %c0_5] : memref<288x128xf32, #tpu.memory_space<vmem>>, vector<1x128xf32>
    %c152 = arith.constant 152 : index
    %c0_6 = arith.constant 0 : index
    %5 = vector.load %arg2[%c152, %c0_6] : memref<288x128xf32, #tpu.memory_space<vmem>>, vector<128x128xf32>
    %c280 = arith.constant 280 : index
    %c0_7 = arith.constant 0 : index
    %6 = vector.load %arg2[%c280, %c0_7] : memref<288x128xf32, #tpu.memory_space<vmem>>, vector<1x128xf32>
    %cst = arith.constant dense<0.000000e+00> : vector<128x128xf32>
    %7 = tpu.matmul %0, %1, %cst {dimension_numbers = #tpu.dot_dimension_numbers<[1], [0], [0], [1], [0, 0, 1, 1], [], []>} : vector<128x3xf32>, vector<3x128xf32>, vector<128x128xf32> -> vector<128x128xf32>
    %8 = vector.broadcast %2 : vector<1x128xf32> to vector<128x128xf32>
    %9 = arith.addf %7, %8 : vector<128x128xf32>
    %cst_8 = arith.constant 0.000000e+00 : f32
    %10 = vector.broadcast %cst_8 : f32 to vector<128x128xf32>
    %11 = arith.maximumf %9, %10 : vector<128x128xf32>
    %cst_9 = arith.constant dense<0.000000e+00> : vector<128x128xf32>
    %12 = tpu.matmul %11, %3, %cst_9 {dimension_numbers = #tpu.dot_dimension_numbers<[1], [0], [0], [1], [0, 0, 1, 1], [], []>} : vector<128x128xf32>, vector<128x128xf32>, vector<128x128xf32> -> vector<128x128xf32>
    %13 = vector.broadcast %4 : vector<1x128xf32> to vector<128x128xf32>
    %14 = arith.addf %12, %13 : vector<128x128xf32>
    %cst_10 = arith.constant 0.000000e+00 : f32
    %15 = vector.broadcast %cst_10 : f32 to vector<128x128xf32>
    %16 = arith.maximumf %14, %15 : vector<128x128xf32>
    %cst_11 = arith.constant dense<0.000000e+00> : vector<128x128xf32>
    %17 = tpu.matmul %16, %5, %cst_11 {dimension_numbers = #tpu.dot_dimension_numbers<[1], [0], [0], [1], [0, 0, 1, 1], [], []>} : vector<128x128xf32>, vector<128x128xf32>, vector<128x128xf32> -> vector<128x128xf32>
    %18 = vector.broadcast %6 : vector<1x128xf32> to vector<128x128xf32>
    %19 = arith.addf %17, %18 : vector<128x128xf32>
    %20 = vector.extract_strided_slice %19 {offsets = [0, 0], sizes = [128, 92], strides = [1, 1]} : vector<128x128xf32> to vector<128x92xf32>
    %c0_12 = arith.constant 0 : index
    %c0_13 = arith.constant 0 : index
    %21 = vector.load %arg3[%c0_12, %c0_13] : memref<128x92xf32, #tpu.memory_space<vmem>>, vector<128x92xf32>
    tpu.vector_store %arg3[%c0_12, %c0_13], %20 {strides = array<i32>} : memref<128x92xf32, #tpu.memory_space<vmem>>, vector<128x92xf32>,
    return
  }
  func.func @transform_0(%arg0: i32) -> (i32, i32) {
    %c0_i32 = arith.constant 0 : i32
    %c0_i32_0 = arith.constant 0 : i32
    return %arg0, %c0_i32 : i32, i32
  }
  func.func @transform_1(%arg0: i32) -> (i32, i32) {
    %c0_i32 = arith.constant 0 : i32
    %c0_i32_0 = arith.constant 0 : i32
    %c0_i32_1 = arith.constant 0 : i32
    return %c0_i32, %c0_i32_0 : i32, i32
  }
  func.func @transform_2(%arg0: i32) -> (i32, i32) {
    %c0_i32 = arith.constant 0 : i32
    %c0_i32_0 = arith.constant 0 : i32
    return %arg0, %c0_i32 : i32, i32
  }
}

</mosaic_0001>

<bundles_post_ra>
// kernel: tpu_custom_call.1
= control target key start
LH: loop header
LB: loop body
LE: loop exit
PB: predicated region body
PF: predicated region fallthrough
CT: control target
= control target key end

     0   :  { %7 = vsyncpa [#allocation3], 0  ;;  %s1226_s9 = smov 0   ;;  %s1360_s0 = inlined_call_operand.vmem [shape: f32[256,3], index: 0, kind: input, shape index: {}]   ;;  %s1361_s1 = inlined_call_operand.hbm [shape: f32[288,128], index: 1, kind: input, shape index: {}]   ;;  %s1362_s2 = inlined_call_operand.vmem [shape: f32[256,92], index: 2, kind: output, shape index: {}]  }
   0x1 LB: > { %s831_s10 = sadd.s32 4294967295, %s1206_s9   ;;  %p833_p0 = scmp.ge.s32.totalorder %s1206_s9, 1  ;;  %s1206_s9 = sphi %s1226_s9, %s13_s9  }
   0x2   : > { %p91_p1 = scmp.lt.s32.totalorder %s1206_s9, 3  ;;  %s1208_s11 = smov [#allocation2]  }
   0x3   : > { %s103_s12 = sshll.u32 %s1208_s11, 4  ;;  %p1240_p3 = scmp.eq.s32.totalorder %s831_s10, 0  ;;  %s104_s12 = int_to_ptr.vmem [resolvable:$true] %s103_s12 }
   0x4   : > { %p1234_p2 = pnand %p833_p0, %p91_p1  ;;  %s1168_s18 = scalar_lea.hbm %s1361_s1, 4608 }
   0x5   : > { %s1367_s14 = scalar_select %p1240_p3, 1, 0 }
   0x6   : > { %s1366_s13 = scalar_select %p1234_p2, 1, 0 }
   0x7   : > { %p1151_p4 = pneg %p1234_p2  ;;  %p1169_p6 = scmp.ne.s32.totalorder %s1361_s1, %s1168_s18 }
   0x8   : > { %p1175_p10 = scmp.lt.u32.totalorder %s1168_s18, %s1361_s1 }
   0x9   : > { %p1248_p5 = pnand %p1240_p3, %p1151_p4 }
   0xb   : > { %p1170_p7 = pneg %p1248_p5 }
   0xd   : > { %p1171_p8 = pnand %p1170_p7, %p1169_p6 }
   0xf   : > { %p1172_p9 = pneg %p1171_p8 }
  0x11   : > { %p1177_p11 = pnand %p1175_p10, %p1172_p9 }
  0x13   : > { %1180 = shalt.err (!%p1177_p11)
}
  0x14   : > { %s1181_s23 = scalar_lea.vmem %s104_s12, 4608  ;;  %p1189_p1 = scmp.lt.s32.totalorder %s104_s12, %s104_s12 }
  0x15   : > { %p1182_p12 = scmp.ne.s32.totalorder %s104_s12, %s1181_s23  ;;  %p1190_p4 = scmp.lt.s32.totalorder %s1181_s23, %s1181_s23 }
  0x17   : > { %p1184_p13 = pnand %p1182_p12, %p1170_p7  ;;  %p1191_p3 = por %p1190_p4, %p1189_p1 }
  0x19   : > { %p1185_p0 = pneg %p1184_p13 }
  0x1b   : > { %p1192_p2 = pnand %p1191_p3, %p1185_p0 }
  0x1d   : > { %1195 = shalt.err (!%p1192_p2)
}
  0x1e   : > { %s1209_s24 = smov 128   ;;  %s1210_s25 = smov 8  }
  0x1f   : > { %1154 = dma.hbm_to_vmem [thread:$0]  (!%p1248_p5), %s1361_s1, 4608, %s104_s12, [#allocation3], %s1209_s24, %s1209_s24, %s1210_s25  }
  0x20   : > { %p1369_p6 = scmp.ne.s32.totalorder %s1366_s13, 0 }
  0x21   : > { %p1370_p8 = scmp.ne.s32.totalorder (!%p1369_p6), %s1367_s14, 0 }
  0x22   : > { %128 = sbr.rel (%p1369_p6) target bundleno = 730 (0x2da), region = 28 }
  0x29   : > { %1201 = dma.done.wait (%p1370_p8), [#allocation3], 4608  }
  0x2a   : > { %1203 = vsyncadd (%p1370_p8), [#allocation3], 4294962688  ;;  %s838_s28 = sshll.u32 %s831_s10, 4  ;;  %vm267_vm0 = vcmask 1042432   ;;  %vm218_vm1 = vcmask 23552   ;;  %v180_v6 = vld [vmem:[#allocation2 + $0x10] sm:$0xff] }
  0x2b   : > { %p151_p2 = scmp.lt.s32.totalorder %s838_s28, 31  ;;  %v178_v0 = vld [vmem:[#allocation2] sm:$0x7]  ;;  %v181_v7 = vld [vmem:[#allocation2 + $0x18] sm:$0xff]  ;;  %v183_v9 = vld [vmem:[#allocation2 + $0x28] sm:$0xff]  ;;  %vm746_vm2 = vcmask 752640  }
  0x2c   : > { %945 = vmatprep.subr.msk.mxu0 %vm267_vm0, %v178_v0  ;;  %v182_v8 = vld [vmem:[#allocation2 + $0x20] sm:$0xff]  ;;  %v1083_v10 = vpack.c.bf16 %v181_v7, %v180_v6  ;;  %v184_v13 = vld [vmem:[#allocation2 + $0x30] sm:$0xff]  ;;  %v185_v14 = vld [vmem:[#allocation2 + $0x38] sm:$0xff] }
  0x2d   : > { %s1372_s28 = smov (!%p151_p2, %s838_s28), 31  ;;  %946 = vmatpush3.msk.msra.mxu0 %vm267_vm0, %v178_v0  ;;  %v1087_v11 = vpack.c.bf16 %v183_v9, %v182_v8  ;;  %v1091_v16 = vpack.c.bf16 %v185_v14, %v184_v13  ;;  %v186_v18 = vld [vmem:[#allocation2 + $0x40] sm:$0xff]  ;;  %v187_v19 = vld [vmem:[#allocation2 + $0x48] sm:$0xff]  ;;  %v188_v23 = vld [vmem:[#allocation2 + $0x50] sm:$0xff] }
  0x2e   : > { %s839_s29 = sshll.u32 %s1372_s28, 3  ;;  %1084 = vmatprep.subr.bf16.mxu1 %v1083_v10  ;;  %v1095_v21 = vpack.c.bf16 %v187_v19, %v186_v18  ;;  %v189_v24 = vld [vmem:[#allocation2 + $0x58] sm:$0xff]  ;;  %v190_v28 = vld [vmem:[#allocation2 + $0x60] sm:$0xff]  ;;  %v191_v29 = vld [vmem:[#allocation2 + $0x68] sm:$0xff] }
  0x2f   : > { %s1284_s4 = scalar_lea.vmem %s1360_s0, %s839_s29  ;;  %1086 = vmatpush3.bf16.msra.mxu1 %v1083_v10  ;;  %v1099_v26 = vpack.c.bf16 %v189_v24, %v188_v23  ;;  %v1103_v31 = vpack.c.bf16 %v191_v29, %v190_v28  ;;  %v192_v33 = vld [vmem:[#allocation2 + $0x70] sm:$0xff]  ;;  %v193_v34 = vld [vmem:[#allocation2 + $0x78] sm:$0xff]  ;;  %v194_v38 = vld [vmem:[#allocation2 + $0x80] sm:$0xff]  ;;  %s1323_s7 = scalar_lea.vmem %s1362_s2, %s839_s29 }
  0x30   : > { %v162_v1 = vld [vmem:[%s1284_s4] sm:$0xff]  ;;  %v163_v2 = vld [vmem:[%s1284_s4 + $0x8] sm:$0xff]  ;;  %v164_v3 = vld [vmem:[%s1284_s4 + $0x10] sm:$0xff]  ;;  %1088 = vmatprep.subr.bf16.mxu1 %v1087_v11  ;;  %v1107_v36 = vpack.c.bf16 %v193_v34, %v192_v33 }
  0x31   : > { %947 = vmatprep.mubr.msk.f32.mxu0 %vm218_vm1, %v162_v1  ;;  %v165_v4 = vld [vmem:[%s1284_s4 + $0x18] sm:$0xff]  ;;  %v166_v5 = vld [vmem:[%s1284_s4 + $0x20] sm:$0xff]  ;;  %v167_v12 = vld [vmem:[%s1284_s4 + $0x28] sm:$0xff] }
  0x32   : > { %948 = vmatmul.mubr.msk.f32.vlgmr.msra.gmra.mrb[0].mxu0 %vm218_vm1, %v163_v2  ;;  %v168_v15 = vld [vmem:[%s1284_s4 + $0x30] sm:$0xff]  ;;  %v169_v17 = vld [vmem:[%s1284_s4 + $0x38] sm:$0xff]  ;;  %v170_v20 = vld [vmem:[%s1284_s4 + $0x40] sm:$0xff] }
  0x33   : > { %950 = vmatprep.mubr.msk.f32.mxu0 %vm218_vm1, %v164_v3  ;;  %1090 = vmatpush3.bf16.msra.mxu1 %v1087_v11  ;;  %v171_v22 = vld [vmem:[%s1284_s4 + $0x48] sm:$0xff]  ;;  %v172_v25 = vld [vmem:[%s1284_s4 + $0x50] sm:$0xff]  ;;  %v173_v27 = vld [vmem:[%s1284_s4 + $0x58] sm:$0xff] }
  0x34   : > { %1092 = vmatprep.subr.bf16.mxu1 %v1091_v16  ;;  %v174_v30 = vld [vmem:[%s1284_s4 + $0x60] sm:$0xff]  ;;  %v175_v32 = vld [vmem:[%s1284_s4 + $0x68] sm:$0xff]  ;;  %v176_v35 = vld [vmem:[%s1284_s4 + $0x70] sm:$0xff] }
  0x35   : > { %v177_v37 = vld [vmem:[%s1284_s4 + $0x78] sm:$0xff]  ;;  %v195_v39 = vld [vmem:[#allocation2 + $0x88] sm:$0xff]  ;;  %v198_v42 = vld [vmem:[#allocation2 + $0xa0] sm:$0xff] }
  0x36   : > { %951 = vmatmul.mubr.msk.f32.gmra.mrb[2].mxu0 %vm218_vm1, %v165_v4  ;;  %v1111_v40 = vpack.c.bf16 %v195_v39, %v194_v38  ;;  %v197_v41 = vld [vmem:[#allocation2 + $0x98] sm:$0xff]  ;;  %v199_v43 = vld [vmem:[#allocation2 + $0xa8] sm:$0xff]  ;;  %v200_v45 = vld [vmem:[#allocation2 + $0xb0] sm:$0xff] }
  0x37   : > { %953 = vmatprep.mubr.msk.f32.mxu0 %vm218_vm1, %v166_v5  ;;  %1094 = vmatpush3.bf16.msra.mxu1 %v1091_v16  ;;  %v1115_v44 = vpack.c.bf16 %v198_v42, %v197_v41  ;;  %v1119_v46 = vpack.c.bf16 %v200_v45, %v199_v43  ;;  %v201_v47 = vld [vmem:[#allocation2 + $0xb8] sm:$0xff]  ;;  %v202_v48 = vld [vmem:[#allocation2 + $0xc0] sm:$0xff]  ;;  %v203_v50 = vld [vmem:[#allocation2 + $0xc8] sm:$0xff] }
  0x38   : > { %1096 = vmatprep.subr.bf16.mxu1 %v1095_v21  ;;  %v1123_v49 = vpack.c.bf16 %v202_v48, %v201_v47  ;;  %v204_v51 = vld [vmem:[#allocation2 + $0xd0] sm:$0xff]  ;;  %v205_v53 = vld [vmem:[#allocation2 + $0xd8] sm:$0xff]  ;;  %v206_v54 = vld [vmem:[#allocation2 + $0xe0] sm:$0xff] }
  0x39   : > { %1116 = vmatprep.subr.bf16.mxu0 %v1115_v44  ;;  %v1127_v52 = vpack.c.bf16 %v204_v51, %v203_v50  ;;  %v1131_v55 = vpack.c.bf16 %v206_v54, %v205_v53  ;;  %v207_v56 = vld [vmem:[#allocation2 + $0xe8] sm:$0xff]  ;;  %v208_v57 = vld [vmem:[#allocation2 + $0xf0] sm:$0xff]  ;;  %v209_v59 = vld [vmem:[#allocation2 + $0xf8] sm:$0xff] }
  0x3a   : > { %954 = vmatmul.mubr.msk.f32.gmra.mrb[4].mxu0 %vm218_vm1, %v167_v12  ;;  %v1135_v58 = vpack.c.bf16 %v208_v57, %v207_v56  ;;  %v210_v60 = vld [vmem:[#allocation2 + $0x100] sm:$0xff]  ;;  %v842_v62 = vld [vmem:[#allocation2 + $0x8] ss:$0 sm:$0xff]  ;;  %v212_v48 = vld [vmem:[#allocation2 + $0x110] sm:$0xff] }
  0x3b   : > { %956 = vmatprep.mubr.msk.f32.mxu0 %vm218_vm1, %v168_v15  ;;  %1098 = vmatpush3.bf16.msra.mxu1 %v1095_v21  ;;  %v1139_v61 = vpack.c.bf16 %v210_v60, %v209_v59  ;;  %v211_v47 = vld [vmem:[#allocation2 + $0x108] sm:$0xff]  ;;  %v860_v50 = vld [vmem:[#allocation2 + $0x90] ss:$0 sm:$0xff] }
  0x3c   : > { %1100 = vmatprep.subr.bf16.mxu1 %v1099_v26  ;;  %1118 = vmatpush3.bf16.msra.mxu0 %v1115_v44 }
  0x3d   : > { %1120 = vmatprep.subr.bf16.mxu0 %v1119_v46 }
  0x3e   : > { %957 = vmatmul.mubr.msk.f32.gmra.mrb[6].mxu0 %vm218_vm1, %v169_v17 }
  0x3f   : > { %959 = vmatprep.mubr.msk.f32.mxu0 %vm218_vm1, %v170_v20  ;;  %1102 = vmatpush3.bf16.msra.mxu1 %v1099_v26 }
  0x40   : > { %1104 = vmatprep.subr.bf16.mxu1 %v1103_v31  ;;  %1122 = vmatpush3.bf16.msra.mxu0 %v1119_v46 }
  0x41   : > { %1124 = vmatprep.subr.bf16.mxu0 %v1123_v49 }
  0x42   : > { %960 = vmatmul.mubr.msk.f32.gmra.mrb[8].mxu0 %vm218_vm1, %v171_v22 }
  0x43   : > { %962 = vmatprep.mubr.msk.f32.mxu0 %vm218_vm1, %v172_v25  ;;  %1106 = vmatpush3.bf16.msra.mxu1 %v1103_v31 }
  0x44   : > { %1108 = vmatprep.subr.bf16.mxu1 %v1107_v36  ;;  %1126 = vmatpush3.bf16.msra.mxu0 %v1123_v49  ;;  %v1143_v49 = vpack.c.bf16 %v212_v48, %v211_v47 }
  0x45   : > { %1128 = vmatprep.subr.bf16.mxu0 %v1127_v52 }
  0x46   : > { %963 = vmatmul.mubr.msk.f32.gmra.mrb[10].mxu0 %vm218_vm1, %v173_v27 }
  0x47   : > { %965 = vmatprep.mubr.msk.f32.mxu0 %vm218_vm1, %v174_v30  ;;  %1110 = vmatpush3.bf16.msra.mxu1 %v1107_v36 }
  0x48   : > { %1112 = vmatprep.subr.bf16.mxu1 %v1111_v40  ;;  %1130 = vmatpush3.bf16.msra.mxu0 %v1127_v52 }
  0x49   : > { %1132 = vmatprep.subr.bf16.mxu0 %v1131_v55 }
  0x4a   : > { %966 = vmatmul.mubr.msk.f32.gmra.mrb[12].mxu0 %vm218_vm1, %v175_v32 }
  0x4b   : > { %968 = vmatprep.mubr.msk.f32.mxu0 %vm218_vm1, %v176_v35  ;;  %1114 = vmatpush3.bf16.msra.mxu1 %v1111_v40 }
  0x4c   : > { %1134 = vmatpush3.bf16.msra.mxu0 %v1131_v55 }
  0x4d   : > { %1136 = vmatprep.subr.bf16.mxu0 %v1135_v58 }
  0x4e   : > { %969 = vmatmul.mubr.msk.f32.gmra.mrb[14].mxu0 %vm218_vm1, %v177_v37 }
  0x50   : > { %1138 = vmatpush3.bf16.msra.mxu0 %v1135_v58 }
  0x51   : > { %1140 = vmatprep.subr.bf16.mxu0 %v1139_v61 }
  0x54   : > { %1142 = vmatpush3.bf16.msra.mxu0 %v1139_v61 }
  0x55   : > { %1144 = vmatprep.subr.bf16.mxu0 %v1143_v49 }
  0x58   : > { %1146 = vmatpush3.bf16.msra.mxu0 %v1143_v49 }
 0x105   : > { %v949_v63 = vpop.f32.mrb[0].mxu0 }
 0x106   : > { %v343_v0 = vadd.f32 %v949_v63, %v842_v62  ;;  %v337_v1 = vpop.f32.mrb[1].mxu0 }
 0x107   : > { %v338_v2 = vadd.f32 %v842_v62, %v337_v1 }
 0x108   : > { %v417_v5 = vmax.f32 %v343_v0, 0.0 }
 0x109   : > { %v952_v3 = vpop.f32.mrb[2].mxu0  ;;  %v416_v4 = vmax.f32 %v338_v2, 0.0 }
 0x10a   : > { %v353_v6 = vadd.f32 %v952_v3, %v842_v62  ;;  %v347_v7 = vpop.f32.mrb[3].mxu0 }
 0x10b   : > { %v348_v8 = vadd.f32 %v842_v62, %v347_v7  ;;  %1003 = vmatprep.mubr.f32.mxu1 %v416_v4 }
 0x10c   : > { %1004 = vmatmul.mubr.f32.vlgmr.msra.gmra.mrb[0].mxu1 %v417_v5  ;;  %v419_v11 = vmax.f32 %v353_v6, 0.0 }
 0x10d   : > { %v418_v9 = vmax.f32 %v348_v8, 0.0  ;;  %v955_v10 = vpop.f32.mrb[4].mxu0 }
 0x10e   : > { %v363_v12 = vadd.f32 %v955_v10, %v842_v62  ;;  %v357_v13 = vpop.f32.mrb[5].mxu0 }
 0x10f   : > { %v358_v14 = vadd.f32 %v842_v62, %v357_v13  ;;  %1006 = vmatprep.mubr.f32.mxu1 %v418_v9 }
 0x110   : > { %1007 = vmatmul.mubr.f32.gmra.mrb[2].mxu1 %v419_v11  ;;  %v421_v17 = vmax.f32 %v363_v12, 0.0 }
 0x111   : > { %v420_v15 = vmax.f32 %v358_v14, 0.0  ;;  %v958_v16 = vpop.f32.mrb[6].mxu0 }
 0x112   : > { %v373_v18 = vadd.f32 %v958_v16, %v842_v62  ;;  %v367_v19 = vpop.f32.mrb[7].mxu0 }
 0x113   : > { %v368_v20 = vadd.f32 %v842_v62, %v367_v19  ;;  %1009 = vmatprep.mubr.f32.mxu1 %v420_v15 }
 0x114   : > { %1010 = vmatmul.mubr.f32.gmra.mrb[4].mxu1 %v421_v17  ;;  %v423_v23 = vmax.f32 %v373_v18, 0.0 }
 0x115   : > { %v422_v21 = vmax.f32 %v368_v20, 0.0  ;;  %v961_v22 = vpop.f32.mrb[8].mxu0 }
 0x116   : > { %v383_v24 = vadd.f32 %v961_v22, %v842_v62  ;;  %v377_v25 = vpop.f32.mrb[9].mxu0 }
 0x117   : > { %v378_v26 = vadd.f32 %v842_v62, %v377_v25  ;;  %1012 = vmatprep.mubr.f32.mxu1 %v422_v21 }
 0x118   : > { %1013 = vmatmul.mubr.f32.gmra.mrb[6].mxu1 %v423_v23  ;;  %v425_v29 = vmax.f32 %v383_v24, 0.0 }
 0x119   : > { %v424_v27 = vmax.f32 %v378_v26, 0.0  ;;  %v964_v28 = vpop.f32.mrb[10].mxu0 }
 0x11a   : > { %v393_v30 = vadd.f32 %v964_v28, %v842_v62  ;;  %v387_v31 = vpop.f32.mrb[11].mxu0 }
 0x11b   : > { %v388_v32 = vadd.f32 %v842_v62, %v387_v31  ;;  %1015 = vmatprep.mubr.f32.mxu1 %v424_v27 }
 0x11c   : > { %1016 = vmatmul.mubr.f32.gmra.mrb[8].mxu1 %v425_v29  ;;  %v427_v35 = vmax.f32 %v393_v30, 0.0 }
 0x11d   : > { %v426_v33 = vmax.f32 %v388_v32, 0.0  ;;  %v967_v34 = vpop.f32.mrb[12].mxu0 }
 0x11e   : > { %v403_v36 = vadd.f32 %v967_v34, %v842_v62  ;;  %v397_v37 = vpop.f32.mrb[13].mxu0 }
 0x11f   : > { %v398_v38 = vadd.f32 %v842_v62, %v397_v37  ;;  %1018 = vmatprep.mubr.f32.mxu1 %v426_v33 }
 0x120   : > { %1019 = vmatmul.mubr.f32.gmra.mrb[10].mxu1 %v427_v35  ;;  %v429_v41 = vmax.f32 %v403_v36, 0.0  ;;  %v861_v35 = vld [vmem:[#allocation2 + $0x118] ss:$0 sm:$0xff] }
 0x121   : > { %v428_v39 = vmax.f32 %v398_v38, 0.0  ;;  %v970_v40 = vpop.f32.mrb[14].mxu0 }
 0x122   : > { %v413_v42 = vadd.f32 %v970_v40, %v842_v62  ;;  %v407_v43 = vpop.f32.mrb[15].mxu0 }
 0x123   : > { %v408_v44 = vadd.f32 %v842_v62, %v407_v43  ;;  %1021 = vmatprep.mubr.f32.mxu1 %v428_v39 }
 0x124   : > { %1022 = vmatmul.mubr.f32.gmra.mrb[12].mxu1 %v429_v41  ;;  %v431_v46 = vmax.f32 %v413_v42, 0.0 }
 0x125   : > { %v430_v45 = vmax.f32 %v408_v44, 0.0 }
 0x127   : > { %1024 = vmatprep.mubr.f32.mxu1 %v430_v45 }
 0x128   : > { %1025 = vmatmul.mubr.f32.gmra.mrb[14].mxu1 %v431_v46 }
 0x1df   : > { %v1005_v51 = vpop.f32.mrb[0].mxu1 }
 0x1e0   : > { %v508_v52 = vadd.f32 %v1005_v51, %v860_v50  ;;  %v502_v53 = vpop.f32.mrb[1].mxu1 }
 0x1e1   : > { %v503_v54 = vadd.f32 %v860_v50, %v502_v53 }
 0x1e2   : > { %v582_v57 = vmax.f32 %v508_v52, 0.0 }
 0x1e3   : > { %v581_v55 = vmax.f32 %v503_v54, 0.0  ;;  %v1008_v56 = vpop.f32.mrb[2].mxu1 }
 0x1e4   : > { %v518_v58 = vadd.f32 %v1008_v56, %v860_v50  ;;  %v512_v59 = vpop.f32.mrb[3].mxu1 }
 0x1e5   : > { %v513_v60 = vadd.f32 %v860_v50, %v512_v59  ;;  %1059 = vmatprep.mubr.f32.mxu0 %v581_v55 }
 0x1e6   : > { %1060 = vmatmul.mubr.f32.vlgmr.msra.gmra.mrb[16].mxu0 %v582_v57  ;;  %v584_v63 = vmax.f32 %v518_v58, 0.0 }
 0x1e7   : > { %v583_v61 = vmax.f32 %v513_v60, 0.0  ;;  %v1011_v62 = vpop.f32.mrb[4].mxu1 }
 0x1e8   : > { %v528_v0 = vadd.f32 %v1011_v62, %v860_v50  ;;  %v522_v1 = vpop.f32.mrb[5].mxu1 }
 0x1e9   : > { %v523_v2 = vadd.f32 %v860_v50, %v522_v1  ;;  %1062 = vmatprep.mubr.f32.mxu0 %v583_v61 }
 0x1ea   : > { %1063 = vmatmul.mubr.f32.gmra.mrb[18].mxu0 %v584_v63  ;;  %v586_v5 = vmax.f32 %v528_v0, 0.0 }
 0x1eb   : > { %v585_v3 = vmax.f32 %v523_v2, 0.0  ;;  %v1014_v4 = vpop.f32.mrb[6].mxu1 }
 0x1ec   : > { %v538_v6 = vadd.f32 %v1014_v4, %v860_v50  ;;  %v532_v7 = vpop.f32.mrb[7].mxu1 }
 0x1ed   : > { %v533_v8 = vadd.f32 %v860_v50, %v532_v7  ;;  %1065 = vmatprep.mubr.f32.mxu0 %v585_v3 }
 0x1ee   : > { %1066 = vmatmul.mubr.f32.gmra.mrb[20].mxu0 %v586_v5  ;;  %v588_v11 = vmax.f32 %v538_v6, 0.0 }
 0x1ef   : > { %v587_v9 = vmax.f32 %v533_v8, 0.0  ;;  %v1017_v10 = vpop.f32.mrb[8].mxu1 }
 0x1f0   : > { %v548_v12 = vadd.f32 %v1017_v10, %v860_v50  ;;  %v542_v13 = vpop.f32.mrb[9].mxu1 }
 0x1f1   : > { %v543_v14 = vadd.f32 %v860_v50, %v542_v13  ;;  %1068 = vmatprep.mubr.f32.mxu0 %v587_v9 }
 0x1f2   : > { %1069 = vmatmul.mubr.f32.gmra.mrb[22].mxu0 %v588_v11  ;;  %v590_v17 = vmax.f32 %v548_v12, 0.0 }
 0x1f3   : > { %v589_v15 = vmax.f32 %v543_v14, 0.0  ;;  %v1020_v16 = vpop.f32.mrb[10].mxu1 }
 0x1f4   : > { %v558_v18 = vadd.f32 %v1020_v16, %v860_v50  ;;  %v552_v19 = vpop.f32.mrb[11].mxu1 }
 0x1f5   : > { %v553_v20 = vadd.f32 %v860_v50, %v552_v19  ;;  %1071 = vmatprep.mubr.f32.mxu0 %v589_v15 }
 0x1f6   : > { %1072 = vmatmul.mubr.f32.gmra.mrb[24].mxu0 %v590_v17  ;;  %v592_v23 = vmax.f32 %v558_v18, 0.0 }
 0x1f7   : > { %v591_v21 = vmax.f32 %v553_v20, 0.0  ;;  %v1023_v22 = vpop.f32.mrb[12].mxu1 }
 0x1f8   : > { %v568_v24 = vadd.f32 %v1023_v22, %v860_v50  ;;  %v562_v25 = vpop.f32.mrb[13].mxu1 }
 0x1f9   : > { %v563_v26 = vadd.f32 %v860_v50, %v562_v25  ;;  %1074 = vmatprep.mubr.f32.mxu0 %v591_v21 }
 0x1fa   : > { %1075 = vmatmul.mubr.f32.gmra.mrb[26].mxu0 %v592_v23  ;;  %v594_v29 = vmax.f32 %v568_v24, 0.0 }
 0x1fb   : > { %v593_v27 = vmax.f32 %v563_v26, 0.0  ;;  %v1026_v28 = vpop.f32.mrb[14].mxu1 }
 0x1fc   : > { %v578_v30 = vadd.f32 %v1026_v28, %v860_v50  ;;  %v572_v31 = vpop.f32.mrb[15].mxu1 }
 0x1fd   : > { %v573_v32 = vadd.f32 %v860_v50, %v572_v31  ;;  %1077 = vmatprep.mubr.f32.mxu0 %v593_v27 }
 0x1fe   : > { %1078 = vmatmul.mubr.f32.gmra.mrb[28].mxu0 %v594_v29  ;;  %v596_v34 = vmax.f32 %v578_v30, 0.0 }
 0x1ff   : > { %v595_v33 = vmax.f32 %v573_v32, 0.0 }
 0x201   : > { %1080 = vmatprep.mubr.f32.mxu0 %v595_v33 }
 0x202   : > { %1081 = vmatmul.mubr.f32.gmra.mrb[30].mxu0 %v596_v34 }
 0x2b9   : > { %v1061_v36 = vpop.f32.mrb[16].mxu0 }
 0x2ba   : > { %v673_v37 = vadd.f32 %v1061_v36, %v861_v35  ;;  %v667_v38 = vpop.f32.mrb[17].mxu0 }
 0x2bb   : > { %v668_v39 = vadd.f32 %v861_v35, %v667_v38 }
 0x2bc   : > { %748 = vst.msk [vmem:[%s1323_s7 + $0x8] sm:$0xff] %vm746_vm2, %v673_v37 }
 0x2bd   : > { %747 = vst.msk [vmem:[%s1323_s7] sm:$0xff] %vm746_vm2, %v668_v39  ;;  %v1064_v40 = vpop.f32.mrb[18].mxu0 }
 0x2be   : > { %v683_v41 = vadd.f32 %v1064_v40, %v861_v35  ;;  %v677_v42 = vpop.f32.mrb[19].mxu0 }
 0x2bf   : > { %v678_v43 = vadd.f32 %v861_v35, %v677_v42 }
 0x2c0   : > { %750 = vst.msk [vmem:[%s1323_s7 + $0x18] sm:$0xff] %vm746_vm2, %v683_v41 }
 0x2c1   : > { %749 = vst.msk [vmem:[%s1323_s7 + $0x10] sm:$0xff] %vm746_vm2, %v678_v43  ;;  %v1067_v44 = vpop.f32.mrb[20].mxu0 }
 0x2c2   : > { %v693_v45 = vadd.f32 %v1067_v44, %v861_v35  ;;  %v687_v46 = vpop.f32.mrb[21].mxu0 }
 0x2c3   : > { %v688_v47 = vadd.f32 %v861_v35, %v687_v46 }
 0x2c4   : > { %752 = vst.msk [vmem:[%s1323_s7 + $0x28] sm:$0xff] %vm746_vm2, %v693_v45 }
 0x2c5   : > { %751 = vst.msk [vmem:[%s1323_s7 + $0x20] sm:$0xff] %vm746_vm2, %v688_v47  ;;  %v1070_v48 = vpop.f32.mrb[22].mxu0 }
 0x2c6   : > { %v703_v49 = vadd.f32 %v1070_v48, %v861_v35  ;;  %v697_v50 = vpop.f32.mrb[23].mxu0 }
 0x2c7   : > { %v698_v51 = vadd.f32 %v861_v35, %v697_v50 }
 0x2c8   : > { %754 = vst.msk [vmem:[%s1323_s7 + $0x38] sm:$0xff] %vm746_vm2, %v703_v49 }
 0x2c9   : > { %753 = vst.msk [vmem:[%s1323_s7 + $0x30] sm:$0xff] %vm746_vm2, %v698_v51  ;;  %v1073_v52 = vpop.f32.mrb[24].mxu0 }
 0x2ca   : > { %v713_v53 = vadd.f32 %v1073_v52, %v861_v35  ;;  %v707_v54 = vpop.f32.mrb[25].mxu0 }
 0x2cb   : > { %v708_v55 = vadd.f32 %v861_v35, %v707_v54 }
 0x2cc   : > { %756 = vst.msk [vmem:[%s1323_s7 + $0x48] sm:$0xff] %vm746_vm2, %v713_v53 }
 0x2cd   : > { %755 = vst.msk [vmem:[%s1323_s7 + $0x40] sm:$0xff] %vm746_vm2, %v708_v55  ;;  %v1076_v56 = vpop.f32.mrb[26].mxu0 }
 0x2ce   : > { %v723_v57 = vadd.f32 %v1076_v56, %v861_v35  ;;  %v717_v58 = vpop.f32.mrb[27].mxu0 }
 0x2cf   : > { %v718_v59 = vadd.f32 %v861_v35, %v717_v58 }
 0x2d0   : > { %758 = vst.msk [vmem:[%s1323_s7 + $0x58] sm:$0xff] %vm746_vm2, %v723_v57 }
 0x2d1   : > { %757 = vst.msk [vmem:[%s1323_s7 + $0x50] sm:$0xff] %vm746_vm2, %v718_v59  ;;  %v1079_v60 = vpop.f32.mrb[28].mxu0 }
 0x2d2   : > { %v733_v61 = vadd.f32 %v1079_v60, %v861_v35  ;;  %v727_v62 = vpop.f32.mrb[29].mxu0 }
 0x2d3   : > { %v728_v63 = vadd.f32 %v861_v35, %v727_v62 }
 0x2d4   : > { %760 = vst.msk [vmem:[%s1323_s7 + $0x68] sm:$0xff] %vm746_vm2, %v733_v61 }
 0x2d5   : > { %759 = vst.msk [vmem:[%s1323_s7 + $0x60] sm:$0xff] %vm746_vm2, %v728_v63  ;;  %v1082_v0 = vpop.f32.mrb[30].mxu0 }
 0x2d6   : > { %v743_v1 = vadd.f32 %v1082_v0, %v861_v35  ;;  %v737_v2 = vpop.f32.mrb[31].mxu0 }
 0x2d7   : > { %v738_v3 = vadd.f32 %v861_v35, %v737_v2 }
 0x2d8   : > { %762 = vst.msk [vmem:[%s1323_s7 + $0x78] sm:$0xff] %vm746_vm2, %v743_v1 }
 0x2d9   : > { %761 = vst.msk [vmem:[%s1323_s7 + $0x70] sm:$0xff] %vm746_vm2, %v738_v3 }
 0x2da PF: > { %s13_s9 = sadd.s32 1, %s1206_s9  }
 0x2db   : > { %p10_p3 = scmp.ge.s32.totalorder %s13_s9, 4  }
 0x2dd   :  { %12 = sbr.rel (!%p10_p3) target bundleno = 1 (0x1), region = 63 }
 0x2e4   :  { %785 = vsyncpa [#allocation3], 1 }
 0x2e5   :  { %787 = vsyncpa [#allocation3 + $0x1], 1 }

</bundles_post_ra>
